<compile_context>
chip_gen: v5e
topology: v5e:2x2
jax: 0.10.0
libtpu: 0.0.40
codegen_flags: <defaults>
</compile_context>

<pallas_src>
import math

import jax
import jax.numpy as jnp
from jax.experimental import pallas as pl
from jax.experimental.pallas import tpu as pltpu


_LANES = 128
_MIB = 1024 * 1024


def _round_up(n: int, m: int) -> int:
    return -(-n // m) * m


def _sublane_multiple(dtype) -> int:
    # dtype-aware sublane packing: 8 for 32-bit, 16 for bf16, 32 for int8/fp8
    return max(8, 32 // jnp.dtype(dtype).itemsize)


def _pad2d(a, rows, cols):
    r, c = a.shape
    if r == rows and c == cols:      # fast path: no HBM copy when aligned
        return a
    return jnp.pad(a, ((0, rows - r), (0, cols - c)))


# ---------------------------------------------------------------------------
# kernel
# ---------------------------------------------------------------------------
def _make_decoder_kernel(n_layers: int, gelu: bool, compute_dtype):
    def kernel(x_ref, *refs):
        o_ref = refs[-1]
        h = x_ref[...].astype(compute_dtype)          # bf16 LHS for the MXU
        for i in range(n_layers):
            wt = refs[2 * i][...]                     # (K_pad, N_pad), BN folded, bf16
            b = refs[2 * i + 1][...]                  # (1, N_pad), f32
            acc = jnp.dot(h, wt, preferred_element_type=jnp.float32) + b
            if i < n_layers - 1:                      # hidden layers: activation
                if gelu:
                    acc = jax.nn.gelu(acc, approximate=False)
                else:
                    acc = jnp.maximum(acc, 0.0)
                # nn.Dropout(p=0.05): identity at inference time.
                h = acc.astype(compute_dtype)         # keep inter-layer h in bf16
            else:
                h = acc
        o_ref[...] = h.astype(o_ref.dtype)

    return kernel


# ---------------------------------------------------------------------------
# one-time parameter preprocessing (hoisted out of the forward call)
# ---------------------------------------------------------------------------
def prepare_decoder_params(weights, biases, bn_params, *,
                           param_dtype=jnp.bfloat16):
    """Fold eval-mode BatchNorm1d into the preceding Linear, transpose to
    (in, out), pad lane-dense, and cast weights to `param_dtype`.
    Call once per parameter set and reuse the result across forward calls."""
    n_layers = len(weights)
    assert len(biases) == n_layers and len(bn_params) == n_layers - 1
    d_in = weights[0].shape[1]

    wts, bs = [], []
    for i in range(n_layers):
        w = jnp.asarray(weights[i], jnp.float32)
        b = jnp.asarray(biases[i], jnp.float32)
        if i < n_layers - 1:
            gamma, beta, mean, var, eps = bn_params[i]
            scale = jnp.asarray(gamma, jnp.float32) * jax.lax.rsqrt(
                jnp.asarray(var, jnp.float32) + eps)
            shift = jnp.asarray(beta, jnp.float32) - jnp.asarray(mean, jnp.float32) * scale
            w = w * scale[:, None]
            b = b * scale + shift
        wts.append(w.T)                   # (in, out) so the kernel does h @ wt
        bs.append(b[None, :])             # (1, out)

    dims = (d_in,) + tuple(w.shape[1] for w in wts)
    dims_pad = tuple(_round_up(d, _LANES) for d in dims)

    params = []
    for i in range(n_layers):
        wt_p = _pad2d(wts[i], dims_pad[i], dims_pad[i + 1]).astype(param_dtype)
        b_p = _pad2d(bs[i], 1, dims_pad[i + 1])        # biases stay f32
        params += [wt_p, b_p]
    return tuple(params), dims, dims_pad


# ---------------------------------------------------------------------------
# forward (uses pre-prepared params)
# ---------------------------------------------------------------------------
def decoder_apply(x, prepared, *, gelu=False, tile_m=512):
    params, dims, dims_pad = prepared
    n_layers = len(params) // 2
    dtype = x.dtype
    B, d_in = x.shape
    assert d_in == dims[0]

    param_dtype = params[0].dtype
    p_item = jnp.dtype(param_dtype).itemsize
    io_item = jnp.dtype(dtype).itemsize

    sub = _sublane_multiple(dtype)
    b_pad = _round_up(max(B, sub), sub)
    tile_m = max(sub, min(_round_up(tile_m, sub), b_pad))

    def _vmem_estimate(tm):
        # resident weights/biases are single-buffered (pl.Buffered(1))
        w_bytes = sum(dims_pad[i] * dims_pad[i + 1] for i in range(n_layers)) * p_item
        bias_bytes = sum(dims_pad[1:]) * 4
        io_bytes = 2 * tm * dims_pad[0] * io_item + 2 * tm * dims_pad[-1] * io_item
        live_bytes = tm * max(dims_pad) * (4 + 2 * p_item)   # f32 acc + bf16 h
        return w_bytes + bias_bytes + io_bytes + live_bytes

    # generation-aware VMEM budget (v7x: 64 MiB/TC, v5e/v6e: 128 MiB)
    try:
        vmem_cap = int(pltpu.get_tpu_info().vmem_capacity_bytes)
    except Exception:
        vmem_cap = 64 * _MIB                      # conservative fallback
    vmem_budget = 40 * _MIB if vmem_cap <= 64 * _MIB else 80 * _MIB

    while tile_m > sub and _vmem_estimate(tile_m) > vmem_budget:
        tile_m = max(sub, (tile_m // 2 // sub) * sub)
    if _vmem_estimate(tile_m) > vmem_budget:
        # TODO(synk): stream weights per layer (extra grid axis or
        # pltpu.emit_pipeline over N-tiles) instead of erroring when the
        # folded weights cannot stay resident in VMEM.
        raise ValueError(
            f"Decoder folded weights need ~{_vmem_estimate(tile_m) / _MIB:.1f} MiB "
            f"of VMEM which exceeds the {vmem_budget / _MIB:.0f} MiB budget; "
            "weight streaming is not implemented.")

    # megacore: ensure >=2 grid steps so both v7x TensorCores get work
    if b_pad // tile_m < 2 and b_pad >= 2 * sub:
        tile_m = _round_up(-(-b_pad // 2), sub)

    b_pad = _round_up(b_pad, tile_m)
    grid = (b_pad // tile_m,)

    est = _vmem_estimate(tile_m)
    vmem_limit = int(min(max(est + 16 * _MIB, 32 * _MIB), vmem_cap - 12 * _MIB))

    # ---- build specs (padding is a no-op when already aligned) --------------
    x_p = _pad2d(x, b_pad, dims_pad[0])
    in_specs = [pl.BlockSpec((tile_m, dims_pad[0]), lambda i: (i, 0))]
    for i in range(n_layers):
        wt_p, b_p = params[2 * i], params[2 * i + 1]
        in_specs += [
            # constant index_map -> fetched once, single-buffered resident
            pl.BlockSpec(wt_p.shape, lambda j: (0, 0), pipeline_mode=pl.Buffered(1)),
            pl.BlockSpec(b_p.shape, lambda j: (0, 0), pipeline_mode=pl.Buffered(1)),
        ]

    out = pl.pallas_call(
        _make_decoder_kernel(n_layers, gelu, param_dtype),
        out_shape=jax.ShapeDtypeStruct((b_pad, dims_pad[-1]), dtype),
        grid_spec=pltpu.PrefetchScalarGridSpec(
            num_scalar_prefetch=0,
            grid=grid,
            in_specs=in_specs,
            out_specs=pl.BlockSpec((tile_m, dims_pad[-1]), lambda i: (i, 0)),
        ),
        compiler_params=pltpu.CompilerParams(
            dimension_semantics=("parallel",),
            vmem_limit_bytes=vmem_limit,
        ),
    )(x_p, *params)

    if b_pad == B and dims_pad[-1] == dims[-1]:
        return out
    return out[:B, :dims[-1]]


def decoder_forward_pallas(x, weights, biases, bn_params, *, gelu=False,
                           tile_m=512, param_dtype=jnp.bfloat16):
    """Convenience wrapper (prep + apply).  For inference loops, call
    prepare_decoder_params() once and reuse it with decoder_apply()."""
    prepared = prepare_decoder_params(weights, biases, bn_params,
                                      param_dtype=param_dtype)
    return decoder_apply(x, prepared, gelu=gelu, tile_m=tile_m)


# ---------------------------------------------------------------------------
# pure-JAX reference (unfused, unfolded, f32) for correctness checking
# ---------------------------------------------------------------------------
def decoder_forward_ref(x, weights, biases, bn_params, *, gelu=False):
    h = jnp.asarray(x, jnp.float32)
    n_layers = len(weights)
    for i in range(n_layers):
        h = jnp.dot(h, weights[i].T, precision=jax.lax.Precision.HIGHEST) + biases[i]
        if i < n_layers - 1:
            gamma, beta, mean, var, eps = bn_params[i]
            h = (h - mean) * jax.lax.rsqrt(var + eps) * gamma + beta
            h = jax.nn.gelu(h, approximate=False) if gelu else jnp.maximum(h, 0.0)
            # Dropout: identity at inference.
    return h.astype(x.dtype)


if __name__ == "__main__":
    key = jax.random.PRNGKey(0)
    # Small Decoder: sizes = (8, 32, 32, 16) -> two hidden blocks + output Linear
    sizes = (8, 32, 32, 16)
    batch = 2
    n_layers = len(sizes) - 1

    keys = iter(jax.random.split(key, 4 * n_layers + 1))
    x = jax.random.normal(next(keys), (batch, sizes[0]), dtype=jnp.float32)

    weights, biases, bn_params = [], [], []
    for i in range(n_layers):
        bound = 1.0 / math.sqrt(sizes[i])
        weights.append(jax.random.uniform(next(keys), (sizes[i + 1], sizes[i]),
                                          jnp.float32, -bound, bound))
        biases.append(jax.random.uniform(next(keys), (sizes[i + 1],),
                                         jnp.float32, -bound, bound))
        if i < n_layers - 1:
            kg, kb = jax.random.split(next(keys))
            gamma = jax.random.uniform(kg, (sizes[i + 1],), jnp.float32, 0.5, 1.5)
            beta = 0.1 * jax.random.normal(kb, (sizes[i + 1],), jnp.float32)
            km, kv = jax.random.split(next(keys))
            mean = 0.1 * jax.random.normal(km, (sizes[i + 1],), jnp.float32)
            var = jax.random.uniform(kv, (sizes[i + 1],), jnp.float32, 0.5, 1.5)
            bn_params.append((gamma, beta, mean, var, 1e-5))

    # one-time parameter prep (BN fold / pad / bf16 cast), reused per call
    prepared = prepare_decoder_params(weights, biases, bn_params)
    jax.block_until_ready(prepared[0])

    y = decoder_apply(x, prepared, gelu=False)
    jax.block_until_ready(y)

    y_ref = decoder_forward_ref(x, weights, biases, bn_params, gelu=False)
    assert y.shape == (batch, sizes[-1]) and y.dtype == x.dtype
    # bf16 weights / inter-layer activations -> looser tolerance than f32.
    assert jnp.allclose(y, y_ref, atol=5e-2, rtol=5e-2), \
        float(jnp.max(jnp.abs(y - y_ref)))

    # TODO(synk): training-mode BatchNorm (batch statistics) and RNG Dropout
    # are not implemented; this kernel implements the inference forward pass.
    print("KERNEL_OK")
</pallas_src>

<mosaic_0001>
module attributes {stable_mosaic.version = 11 : i64} {
  func.func @kernel(%arg0: i32, %arg1: memref<8x128xf32, #tpu.memory_space<vmem>>, %arg2: memref<128x128xbf16, #tpu.memory_space<vmem>>, %arg3: memref<1x128xf32, #tpu.memory_space<vmem>>, %arg4: memref<128x128xbf16, #tpu.memory_space<vmem>>, %arg5: memref<1x128xf32, #tpu.memory_space<vmem>>, %arg6: memref<128x128xbf16, #tpu.memory_space<vmem>>, %arg7: memref<1x128xf32, #tpu.memory_space<vmem>>, %arg8: memref<8x128xf32, #tpu.memory_space<vmem>>) attributes {dimension_semantics = [#tpu.dimension_semantics<parallel>], iteration_bounds = array<i64: 1>, scalar_prefetch = 0 : i64, scratch_operands = 0 : i64, tpu.core_type = #tpu.core_type<tc>, window_params = [{transform_indices = @transform_0, window_bounds = array<i64: 8, 128>}, {pipeline_mode = #tpu.pipeline_mode<synchronous>, transform_indices = @transform_1, window_bounds = array<i64: 128, 128>}, {pipeline_mode = #tpu.pipeline_mode<synchronous>, transform_indices = @transform_2, window_bounds = array<i64: 1, 128>}, {pipeline_mode = #tpu.pipeline_mode<synchronous>, transform_indices = @transform_3, window_bounds = array<i64: 128, 128>}, {pipeline_mode = #tpu.pipeline_mode<synchronous>, transform_indices = @transform_4, window_bounds = array<i64: 1, 128>}, {pipeline_mode = #tpu.pipeline_mode<synchronous>, transform_indices = @transform_5, window_bounds = array<i64: 128, 128>}, {pipeline_mode = #tpu.pipeline_mode<synchronous>, transform_indices = @transform_6, window_bounds = array<i64: 1, 128>}, {transform_indices = @transform_7, window_bounds = array<i64: 8, 128>}]} {
    %c0 = arith.constant 0 : index
    %c0_0 = arith.constant 0 : index
    %0 = vector.load %arg1[%c0, %c0_0] : memref<8x128xf32, #tpu.memory_space<vmem>>, vector<8x128xf32>
    %1 = arith.truncf %0 : vector<8x128xf32> to vector<8x128xbf16>
    %c0_1 = arith.constant 0 : index
    %c0_2 = arith.constant 0 : index
    %2 = vector.load %arg2[%c0_1, %c0_2] : memref<128x128xbf16, #tpu.memory_space<vmem>>, vector<128x128xbf16>
    %c0_3 = arith.constant 0 : index
    %c0_4 = arith.constant 0 : index
    %3 = vector.load %arg3[%c0_3, %c0_4] : memref<1x128xf32, #tpu.memory_space<vmem>>, vector<1x128xf32>
    %cst = arith.constant dense<0.000000e+00> : vector<8x128xf32>
    %4 = tpu.matmul %1, %2, %cst {dimension_numbers = #tpu.dot_dimension_numbers<[1], [0], [0], [1], [0, 0, 1, 1], [], []>} : vector<8x128xbf16>, vector<128x128xbf16>, vector<8x128xf32> -> vector<8x128xf32>
    %5 = vector.broadcast %3 : vector<1x128xf32> to vector<8x128xf32>
    %6 = arith.addf %4, %5 : vector<8x128xf32>
    %cst_5 = arith.constant 0.000000e+00 : f32
    %7 = vector.broadcast %cst_5 : f32 to vector<8x128xf32>
    %8 = arith.maximumf %6, %7 : vector<8x128xf32>
    %9 = arith.truncf %8 : vector<8x128xf32> to vector<8x128xbf16>
    %c0_6 = arith.constant 0 : index
    %c0_7 = arith.constant 0 : index
    %10 = vector.load %arg4[%c0_6, %c0_7] : memref<128x128xbf16, #tpu.memory_space<vmem>>, vector<128x128xbf16>
    %c0_8 = arith.constant 0 : index
    %c0_9 = arith.constant 0 : index
    %11 = vector.load %arg5[%c0_8, %c0_9] : memref<1x128xf32, #tpu.memory_space<vmem>>, vector<1x128xf32>
    %cst_10 = arith.constant dense<0.000000e+00> : vector<8x128xf32>
    %12 = tpu.matmul %9, %10, %cst_10 {dimension_numbers = #tpu.dot_dimension_numbers<[1], [0], [0], [1], [0, 0, 1, 1], [], []>} : vector<8x128xbf16>, vector<128x128xbf16>, vector<8x128xf32> -> vector<8x128xf32>
    %13 = vector.broadcast %11 : vector<1x128xf32> to vector<8x128xf32>
    %14 = arith.addf %12, %13 : vector<8x128xf32>
    %cst_11 = arith.constant 0.000000e+00 : f32
    %15 = vector.broadcast %cst_11 : f32 to vector<8x128xf32>
    %16 = arith.maximumf %14, %15 : vector<8x128xf32>
    %17 = arith.truncf %16 : vector<8x128xf32> to vector<8x128xbf16>
    %c0_12 = arith.constant 0 : index
    %c0_13 = arith.constant 0 : index
    %18 = vector.load %arg6[%c0_12, %c0_13] : memref<128x128xbf16, #tpu.memory_space<vmem>>, vector<128x128xbf16>
    %c0_14 = arith.constant 0 : index
    %c0_15 = arith.constant 0 : index
    %19 = vector.load %arg7[%c0_14, %c0_15] : memref<1x128xf32, #tpu.memory_space<vmem>>, vector<1x128xf32>
    %cst_16 = arith.constant dense<0.000000e+00> : vector<8x128xf32>
    %20 = tpu.matmul %17, %18, %cst_16 {dimension_numbers = #tpu.dot_dimension_numbers<[1], [0], [0], [1], [0, 0, 1, 1], [], []>} : vector<8x128xbf16>, vector<128x128xbf16>, vector<8x128xf32> -> vector<8x128xf32>
    %21 = vector.broadcast %19 : vector<1x128xf32> to vector<8x128xf32>
    %22 = arith.addf %20, %21 : vector<8x128xf32>
    %c0_17 = arith.constant 0 : index
    %c0_18 = arith.constant 0 : index
    %23 = vector.load %arg8[%c0_17, %c0_18] : memref<8x128xf32, #tpu.memory_space<vmem>>, vector<8x128xf32>
    tpu.vector_store %arg8[%c0_17, %c0_18], %22 {strides = array<i32>} : memref<8x128xf32, #tpu.memory_space<vmem>>, vector<8x128xf32>,
    return
  }
  func.func @transform_0(%arg0: i32) -> (i32, i32) {
    %c0_i32 = arith.constant 0 : i32
    %c0_i32_0 = arith.constant 0 : i32
    return %arg0, %c0_i32 : i32, i32
  }
  func.func @transform_1(%arg0: i32) -> (i32, i32) {
    %c0_i32 = arith.constant 0 : i32
    %c0_i32_0 = arith.constant 0 : i32
    %c0_i32_1 = arith.constant 0 : i32
    return %c0_i32, %c0_i32_0 : i32, i32
  }
  func.func @transform_2(%arg0: i32) -> (i32, i32) {
    %c0_i32 = arith.constant 0 : i32
    %c0_i32_0 = arith.constant 0 : i32
    %c0_i32_1 = arith.constant 0 : i32
    return %c0_i32, %c0_i32_0 : i32, i32
  }
  func.func @transform_3(%arg0: i32) -> (i32, i32) {
    %c0_i32 = arith.constant 0 : i32
    %c0_i32_0 = arith.constant 0 : i32
    %c0_i32_1 = arith.constant 0 : i32
    return %c0_i32, %c0_i32_0 : i32, i32
  }
  func.func @transform_4(%arg0: i32) -> (i32, i32) {
    %c0_i32 = arith.constant 0 : i32
    %c0_i32_0 = arith.constant 0 : i32
    %c0_i32_1 = arith.constant 0 : i32
    return %c0_i32, %c0_i32_0 : i32, i32
  }
  func.func @transform_5(%arg0: i32) -> (i32, i32) {
    %c0_i32 = arith.constant 0 : i32
    %c0_i32_0 = arith.constant 0 : i32
    %c0_i32_1 = arith.constant 0 : i32
    return %c0_i32, %c0_i32_0 : i32, i32
  }
  func.func @transform_6(%arg0: i32) -> (i32, i32) {
    %c0_i32 = arith.constant 0 : i32
    %c0_i32_0 = arith.constant 0 : i32
    %c0_i32_1 = arith.constant 0 : i32
    return %c0_i32, %c0_i32_0 : i32, i32
  }
  func.func @transform_7(%arg0: i32) -> (i32, i32) {
    %c0_i32 = arith.constant 0 : i32
    %c0_i32_0 = arith.constant 0 : i32
    return %arg0, %c0_i32 : i32, i32
  }
}

</mosaic_0001>

<bundles_post_ra>
// kernel: tpu_custom_call.1
= control target key start
LH: loop header
LB: loop body
LE: loop exit
PB: predicated region body
PF: predicated region fallthrough
CT: control target
= control target key end

     0   :  { %12 = vsyncpa [#allocation3], 0  ;;  %s686_s0 = inlined_call_operand.hbm [shape: f32[8,128], index: 0, kind: input, shape index: {}]   ;;  %s687_s1 = inlined_call_operand.hbm [shape: bf16[128,128], index: 1, kind: input, shape index: {}]   ;;  %s688_s2 = inlined_call_operand.vmem [shape: f32[1,128], index: 2, kind: input, shape index: {}]   ;;  %s689_s3 = inlined_call_operand.hbm [shape: bf16[128,128], index: 3, kind: input, shape index: {}]   ;;  %s690_s4 = inlined_call_operand.vmem [shape: f32[1,128], index: 4, kind: input, shape index: {}]   ;;  %s691_s5 = inlined_call_operand.hbm [shape: bf16[128,128], index: 5, kind: input, shape index: {}]   ;;  %s692_s6 = inlined_call_operand.vmem [shape: f32[1,128], index: 6, kind: input, shape index: {}]   ;;  %s693_s7 = inlined_call_operand.hbm [shape: f32[8,128], index: 7, kind: output, shape index: {}]  }
   0x1   :  { %13 = vsyncpa [#allocation6], 0 }
   0x2   :  { %14 = vsyncpa [#allocation9], 0  ;;  %s31_s26 = sshll.u32 %s687_s1, 4  ;;  %s32_s26 = int_to_ptr.hbm [resolvable:$true] %s31_s26 }
   0x3   :  { %15 = vsyncpa [#allocation4], 0  ;;  %s615_s27 = smov [#allocation5]   ;;  %s21_s8 = sshll.u32 %s686_s0, 4  ;;  %s22_s8 = int_to_ptr.hbm [resolvable:$true] %s21_s8 }
   0x4   :  { %s33_s28 = sshll.u32 %s615_s27, 4  ;;  %s616_s9 = smov 64   ;;  %s34_s28 = int_to_ptr.vmem [resolvable:$true] %s33_s28 }
   0x5   :  { %s617_s10 = smov 4   ;;  %s618_s11 = smov [#allocation2]  }
   0x6   :  { %39 = dma.hbm_to_vmem [thread:$0]  %s32_s26, 1024, %s34_s28, [#allocation6], %s616_s9, %s616_s9, %s617_s10  }
   0x7   :  { %s23_s12 = sshll.u32 %s618_s11, 4  ;;  %s46_s15 = sshll.u32 %s689_s3, 4  ;;  %s24_s12 = int_to_ptr.vmem [resolvable:$true] %s23_s12  ;;  %s47_s15 = int_to_ptr.hbm [resolvable:$true] %s46_s15 }
   0x8   :  { %26 = dma.hbm_to_vmem [thread:$0]  %s22_s8, 128, %s24_s12, [#allocation3]  }
   0x9   :  { %s61_s17 = sshll.u32 %s691_s5, 4  ;;  %s619_s18 = smov [#allocation7]   ;;  %s62_s17 = int_to_ptr.hbm [resolvable:$true] %s61_s17 }
   0xa   :  { %s48_s19 = sshll.u32 %s619_s18, 4  ;;  %s620_s0 = smov [#allocation8]   ;;  %s49_s19 = int_to_ptr.vmem [resolvable:$true] %s48_s19 }
   0xb   :  { %54 = dma.hbm_to_vmem [thread:$0]  %s47_s15, 1024, %s49_s19, [#allocation6], %s616_s9, %s616_s9, %s617_s10  }
   0xc   :  { %s63_s20 = sshll.u32 %s620_s0, 4  ;;  %s64_s20 = int_to_ptr.vmem [resolvable:$true] %s63_s20 }
   0xd   :  { %69 = dma.hbm_to_vmem [thread:$0]  %s62_s17, 1024, %s64_s20, [#allocation9], %s616_s9, %s616_s9, %s617_s10  }
   0xe   :  { %607 = dma.done.wait [#allocation3], 128  }
   0xf   :  { %608 = vsyncadd [#allocation3], 4294967168 }
  0x10   :  { %609 = dma.done.wait [#allocation6], 2048  }
  0x11   :  { %610 = vsyncadd [#allocation6], 4294965248 }
  0x12   :  { %611 = dma.done.wait [#allocation9], 1024  }
  0x13   :  { %612 = vsyncadd [#allocation9], 4294966272  ;;  %v460_v0 = vld [vmem:[#allocation5 + $0x38] sm:$0xff]  ;;  %v459_v1 = vld [vmem:[#allocation5 + $0x30] sm:$0xff]  ;;  %s621_s24 = smov [#allocation10]   ;;  %s345_s28 = sshll.u32 %s693_s7, 4  ;;  %s346_s28 = int_to_ptr.hbm [resolvable:$true] %s345_s28 }
  0x14   :  { %158 = vmatpush.bf16.msra.mxu0 %v460_v0  ;;  %v468_v2 = vld [vmem:[#allocation7 + $0x38] sm:$0xff]  ;;  %v467_v3 = vld [vmem:[#allocation7 + $0x30] sm:$0xff]  ;;  %v458_v4 = vld [vmem:[#allocation5 + $0x28] sm:$0xff]  ;;  %s343_s25 = sshll.u32 %s621_s24, 4  ;;  %s344_s25 = int_to_ptr.vmem [resolvable:$true] %s343_s25 }
  0x15   :  { %241 = vmatpush.bf16.msra.mxu1 %v468_v2  ;;  %v466_v5 = vld [vmem:[#allocation7 + $0x28] sm:$0xff]  ;;  %v457_v6 = vld [vmem:[#allocation5 + $0x20] sm:$0xff]  ;;  %v456_v8 = vld [vmem:[#allocation5 + $0x18] sm:$0xff] }
  0x16   :  { %v465_v7 = vld [vmem:[#allocation7 + $0x20] sm:$0xff]  ;;  %v464_v9 = vld [vmem:[#allocation7 + $0x18] sm:$0xff]  ;;  %v455_v10 = vld [vmem:[#allocation5 + $0x10] sm:$0xff] }
  0x17   :  { %v463_v11 = vld [vmem:[#allocation7 + $0x10] sm:$0xff]  ;;  %v454_v12 = vld [vmem:[#allocation5 + $0x8] sm:$0xff]  ;;  %v453_v13 = vld [vmem:[#allocation5] sm:$0xff] }
  0x18   :  { %159 = vmatpush.bf16.msra.mxu0 %v459_v1  ;;  %v88_v14 = vld [vmem:[#allocation2] sm:$0xff]  ;;  %v462_v16 = vld [vmem:[#allocation7 + $0x8] sm:$0xff]  ;;  %v461_v17 = vld [vmem:[#allocation7] sm:$0xff] }
  0x19   :  { %242 = vmatpush.bf16.msra.mxu1 %v467_v3  ;;  %v89_v15 = vpack.c.bf16 %v88_v14, %v88_v14  ;;  %v476_v18 = vld [vmem:[#allocation8 + $0x38] sm:$0xff]  ;;  %v475_v19 = vld [vmem:[#allocation8 + $0x30] sm:$0xff]  ;;  %v474_v20 = vld [vmem:[#allocation8 + $0x28] sm:$0xff] }
  0x1a   :  { %324 = vmatpush.bf16.msra.mxu2 %v476_v18  ;;  %v473_v21 = vld [vmem:[#allocation8 + $0x20] sm:$0xff]  ;;  %v472_v22 = vld [vmem:[#allocation8 + $0x18] sm:$0xff]  ;;  %v471_v23 = vld [vmem:[#allocation8 + $0x10] sm:$0xff] }
  0x1b   :  { %v484_v24 = vld [vmem:[%s688_s2] ss:$0 sm:$0xff]  ;;  %v470_v30 = vld [vmem:[#allocation8 + $0x8] sm:$0xff]  ;;  %v469_v31 = vld [vmem:[#allocation8] sm:$0xff] }
  0x1c   :  { %160 = vmatpush.bf16.msra.mxu0 %v458_v4  ;;  %v485_v32 = vld [vmem:[%s690_s4] ss:$0 sm:$0xff] }
  0x1d   :  { %243 = vmatpush.bf16.msra.mxu1 %v466_v5  ;;  %v486_v38 = vld [vmem:[%s692_s6] ss:$0 sm:$0xff] }
  0x1e   :  { %325 = vmatpush.bf16.msra.mxu2 %v475_v19 }
  0x20   :  { %161 = vmatpush.bf16.msra.mxu0 %v457_v6 }
  0x21   :  { %244 = vmatpush.bf16.msra.mxu1 %v465_v7 }
  0x22   :  { %326 = vmatpush.bf16.msra.mxu2 %v474_v20 }
  0x24   :  { %162 = vmatpush.bf16.msra.mxu0 %v456_v8 }
  0x25   :  { %245 = vmatpush.bf16.msra.mxu1 %v464_v9 }
  0x26   :  { %327 = vmatpush.bf16.msra.mxu2 %v473_v21 }
  0x28   :  { %163 = vmatpush.bf16.msra.mxu0 %v455_v10 }
  0x29   :  { %246 = vmatpush.bf16.msra.mxu1 %v463_v11 }
  0x2a   :  { %328 = vmatpush.bf16.msra.mxu2 %v472_v22 }
  0x2c   :  { %164 = vmatpush.bf16.msra.mxu0 %v454_v12 }
  0x2d   :  { %247 = vmatpush.bf16.msra.mxu1 %v462_v16 }
  0x2e   :  { %329 = vmatpush.bf16.msra.mxu2 %v471_v23 }
  0x30   :  { %165 = vmatpush.bf16.msra.mxu0 %v453_v13 }
  0x31   :  { %248 = vmatpush.bf16.msra.mxu1 %v461_v17 }
  0x32   :  { %330 = vmatpush.bf16.msra.mxu2 %v470_v30 }
  0x33   :  { %166 = vmatmul.bf16.vlgmr.msra.gmra.mxu0 %v89_v15 }
  0x36   :  { %331 = vmatpush.bf16.msra.mxu2 %v469_v31 }
  0xb0   :  { %v167_v25 = vpop.f32.mrf.mxu0 }
  0xb1   :  { %v168_v26 = vadd.f32 %v484_v24, %v167_v25 }
  0xb3   :  { %v171_v27 = vmax.f32 %v168_v26, 0.0 }
  0xb5   :  { %v172_v28 = vpack.c.bf16 %v171_v27, %v171_v27 }
  0xb7   :  { %249 = vmatmul.bf16.vlgmr.msra.gmra.mxu1 %v172_v28 }
  0xb8   :  { %v169_v29 = vpop.f32.mrf.mxu0 }
 0x134   :  { %v250_v33 = vpop.f32.mrf.mxu1 }
 0x135   :  { %v251_v34 = vadd.f32 %v485_v32, %v250_v33 }
 0x137   :  { %v254_v35 = vmax.f32 %v251_v34, 0.0 }
 0x139   :  { %v255_v36 = vpack.c.bf16 %v254_v35, %v254_v35 }
 0x13b   :  { %332 = vmatmul.bf16.vlgmr.msra.gmra.mxu2 %v255_v36 }
 0x13c   :  { %v252_v37 = vpop.f32.mrf.mxu1 }
 0x1be   :  { %v333_v39 = vpop.f32.mrf.mxu2 }
 0x1bf   :  { %v334_v40 = vadd.f32 %v486_v38, %v333_v39 }
 0x1c1   :  { %337 = vst [vmem:[#allocation10] sm:$0xff] %v334_v40 }
 0x1c2   :  { %348 = dma.vmem_to_hbm [thread:$0]  %s344_s25, 128, %s346_s28, [#allocation4]  }
 0x1c6   :  { %v335_v41 = vpop.f32.mrf.mxu2 }
 0x1c7   :  { %613 = dma.done.wait [#allocation4], 128  }
 0x1c8   :  { %614 = vsyncadd [#allocation4], 4294967168 }
 0x1c9   :  { %353 = vsyncpa [#allocation3], 1 }
 0x1ca   :  { %354 = vsyncpa [#allocation6], 1 }
 0x1cb   :  { %355 = vsyncpa [#allocation9], 1 }
 0x1cc   :  { %356 = vsyncpa [#allocation4], 1 }

</bundles_post_ra>
